<compile_context>
chip_gen: v6e
topology: v6e:2x2x1
jax: 0.10.0
libtpu: 0.0.40
codegen_flags: <defaults>
</compile_context>

<pallas_src>
import functools

import jax
import jax.numpy as jnp
from jax.experimental import pallas as pl
from jax.experimental.pallas import tpu as pltpu


def _round_up(a, m):
    return ((a + m - 1) // m) * m


def _nconv_kernel(at_ref, x_ref, o_ref, *, block_rows, use_bf16):
    """at_ref: (W, V) resident; x_ref: (block_rows, V, L); o_ref: (block_rows, W, L)."""
    at = at_ref[...]
    if use_bf16:
        at = at.astype(jnp.bfloat16)
    # Statically unrolled loop over the row tile: each step is a clean 2-D MXU
    # matmul (W, V) @ (V, L) with L on the lane axis -> no transposes/concats,
    # and the LLO scheduler can interleave MXU pushes/pops across iterations.
    for b in range(block_rows):
        xb = x_ref[b]
        if use_bf16:
            xb = xb.astype(jnp.bfloat16)
        o_ref[b] = jnp.dot(at, xb, preferred_element_type=jnp.float32).astype(o_ref.dtype)


def nconv(x, A, *, block_rows=None, use_bf16=True):
    """einsum('ncvl,vw->ncwl', x, A) as a single Pallas TPU kernel.

    x: (N, C, V, L), A: (V, W)  ->  (N, C, W, L)
    """
    n, c, v, l = x.shape
    v2, w = A.shape
    assert v == v2, (x.shape, A.shape)
    out_dtype = jnp.promote_types(x.dtype, A.dtype)
    itemsize_in = jnp.dtype(x.dtype).itemsize
    itemsize_out = jnp.dtype(out_dtype).itemsize

    rows = n * c
    x3 = x.reshape(rows, v, l)      # pure leading-dim merge, no data movement
    at = jnp.swapaxes(A, 0, 1)      # tiny one-time (V, W) -> (W, V); resident in VMEM

    if block_rows is None:
        # Size the row tile against the *padded* VMEM footprint:
        #   last dim padded to 128 lanes, second-to-last to a multiple of 8 sublanes,
        #   input + output blocks each double-buffered by the pipeline.
        lanes = _round_up(l, 128)
        x_row_bytes = _round_up(v, 8) * lanes * itemsize_in
        o_row_bytes = _round_up(w, 8) * lanes * itemsize_out
        per_row = 2 * (x_row_bytes + o_row_bytes)           # double-buffered in + out
        budget = 4 * 1024 * 1024                             # small vs 16-32 MiB scoped VMEM
        block_rows = max(1, min(rows, budget // max(per_row, 1), 32))
        if rows > 1:
            # keep >= 2 grid steps so the 'parallel' axis can split across v7x TensorCores
            block_rows = min(block_rows, pl.cdiv(rows, 2))
    block_rows = int(block_rows)

    # Partial last block (rows % block_rows != 0) is masked by Pallas: no host pad/slice.
    grid = (pl.cdiv(rows, block_rows),)

    cost = pl.CostEstimate(
        flops=2 * rows * v * w * l,
        transcendentals=0,
        bytes_accessed=(rows * v * l + v * w) * itemsize_in + rows * w * l * itemsize_out,
    )

    out = pl.pallas_call(
        functools.partial(_nconv_kernel, block_rows=block_rows, use_bf16=use_bf16),
        out_shape=jax.ShapeDtypeStruct((rows, w, l), out_dtype),
        grid_spec=pltpu.PrefetchScalarGridSpec(
            num_scalar_prefetch=0,
            grid=grid,
            in_specs=[
                pl.BlockSpec((w, v), lambda i: (0, 0)),                 # A^T, resident
                pl.BlockSpec((block_rows, v, l), lambda i: (i, 0, 0)),  # x row tile
            ],
            out_specs=pl.BlockSpec((block_rows, w, l), lambda i: (i, 0, 0)),
        ),
        compiler_params=pltpu.CompilerParams(dimension_semantics=("parallel",)),
        cost_estimate=cost,
    )(at, x3)
    return out.reshape(n, c, w, l)   # torch .contiguous() is a semantic no-op here


if __name__ == "__main__":
    key = jax.random.PRNGKey(0)
    k1, k2 = jax.random.split(key)
    N, C, V, L = 2, 4, 16, 16       # small shapes consistent with 'ncvl'
    W = 24                          # W != V to exercise the contraction orientation

    x = jax.random.normal(k1, (N, C, V, L), jnp.float32)
    A = jax.random.normal(k2, (V, W), jnp.float32)

    out_bf16 = jax.block_until_ready(nconv(x, A))                   # default: bf16 MXU operands
    out_f32 = jax.block_until_ready(nconv(x, A, use_bf16=False))    # full-precision path

    ref = jnp.einsum('ncvl,vw->ncwl', x, A, precision=jax.lax.Precision.HIGHEST)

    assert out_bf16.shape == (N, C, W, L)
    assert bool(jnp.all(jnp.isfinite(out_bf16)))
    assert float(jnp.max(jnp.abs(out_f32 - ref))) < 1e-3, "f32 path mismatch"
    assert float(jnp.max(jnp.abs(out_bf16 - ref))) < 2.5e-1, "bf16 path mismatch"
    print("KERNEL_OK")
</pallas_src>

<mosaic_0001>
module attributes {stable_mosaic.version = 11 : i64} {
  func.func @_nconv_kernel(%arg0: i32, %arg1: memref<24x16xf32, #tpu.memory_space<vmem>>, %arg2: memref<4x16x16xf32, #tpu.memory_space<vmem>>, %arg3: memref<4x24x16xf32, #tpu.memory_space<vmem>>) attributes {dimension_semantics = [#tpu.dimension_semantics<parallel>], iteration_bounds = array<i64: 2>, scalar_prefetch = 0 : i64, scratch_operands = 0 : i64, tpu.core_type = #tpu.core_type<tc>, window_params = [{pipeline_mode = #tpu.pipeline_mode<synchronous>, transform_indices = @transform_0, window_bounds = array<i64: 24, 16>}, {transform_indices = @transform_1, window_bounds = array<i64: 4, 16, 16>}, {transform_indices = @transform_2, window_bounds = array<i64: 4, 24, 16>}]} {
    %c0 = arith.constant 0 : index
    %c0_0 = arith.constant 0 : index
    %0 = vector.load %arg1[%c0, %c0_0] : memref<24x16xf32, #tpu.memory_space<vmem>>, vector<24x16xf32>
    %1 = arith.truncf %0 : vector<24x16xf32> to vector<24x16xbf16>
    %c0_1 = arith.constant 0 : index
    %c0_2 = arith.constant 0 : index
    %c0_3 = arith.constant 0 : index
    %2 = vector.load %arg2[%c0_1, %c0_2, %c0_3] : memref<4x16x16xf32, #tpu.memory_space<vmem>>, vector<1x16x16xf32>
    %3 = vector.shape_cast %2 : vector<1x16x16xf32> to vector<16x16xf32>
    %4 = arith.truncf %3 : vector<16x16xf32> to vector<16x16xbf16>
    %cst = arith.constant dense<0.000000e+00> : vector<24x16xf32>
    %5 = tpu.matmul %1, %4, %cst {dimension_numbers = #tpu.dot_dimension_numbers<[1], [0], [0], [1], [0, 0, 1, 1], [], []>} : vector<24x16xbf16>, vector<16x16xbf16>, vector<24x16xf32> -> vector<24x16xf32>
    %c0_4 = arith.constant 0 : index
    %c0_5 = arith.constant 0 : index
    %c0_6 = arith.constant 0 : index
    %6 = vector.load %arg3[%c0_4, %c0_5, %c0_6] : memref<4x24x16xf32, #tpu.memory_space<vmem>>, vector<1x24x16xf32>
    %7 = vector.shape_cast %6 : vector<1x24x16xf32> to vector<24x16xf32>
    %8 = vector.shape_cast %5 : vector<24x16xf32> to vector<1x24x16xf32>
    tpu.vector_store %arg3[%c0_4, %c0_5, %c0_6], %8 {strides = array<i32>} : memref<4x24x16xf32, #tpu.memory_space<vmem>>, vector<1x24x16xf32>,
    %c1 = arith.constant 1 : index
    %c0_7 = arith.constant 0 : index
    %c0_8 = arith.constant 0 : index
    %9 = vector.load %arg2[%c1, %c0_7, %c0_8] : memref<4x16x16xf32, #tpu.memory_space<vmem>>, vector<1x16x16xf32>
    %10 = vector.shape_cast %9 : vector<1x16x16xf32> to vector<16x16xf32>
    %11 = arith.truncf %10 : vector<16x16xf32> to vector<16x16xbf16>
    %cst_9 = arith.constant dense<0.000000e+00> : vector<24x16xf32>
    %12 = tpu.matmul %1, %11, %cst_9 {dimension_numbers = #tpu.dot_dimension_numbers<[1], [0], [0], [1], [0, 0, 1, 1], [], []>} : vector<24x16xbf16>, vector<16x16xbf16>, vector<24x16xf32> -> vector<24x16xf32>
    %c1_10 = arith.constant 1 : index
    %c0_11 = arith.constant 0 : index
    %c0_12 = arith.constant 0 : index
    %13 = vector.load %arg3[%c1_10, %c0_11, %c0_12] : memref<4x24x16xf32, #tpu.memory_space<vmem>>, vector<1x24x16xf32>
    %14 = vector.shape_cast %13 : vector<1x24x16xf32> to vector<24x16xf32>
    %15 = vector.shape_cast %12 : vector<24x16xf32> to vector<1x24x16xf32>
    tpu.vector_store %arg3[%c1_10, %c0_11, %c0_12], %15 {strides = array<i32>} : memref<4x24x16xf32, #tpu.memory_space<vmem>>, vector<1x24x16xf32>,
    %c2 = arith.constant 2 : index
    %c0_13 = arith.constant 0 : index
    %c0_14 = arith.constant 0 : index
    %16 = vector.load %arg2[%c2, %c0_13, %c0_14] : memref<4x16x16xf32, #tpu.memory_space<vmem>>, vector<1x16x16xf32>
    %17 = vector.shape_cast %16 : vector<1x16x16xf32> to vector<16x16xf32>
    %18 = arith.truncf %17 : vector<16x16xf32> to vector<16x16xbf16>
    %cst_15 = arith.constant dense<0.000000e+00> : vector<24x16xf32>
    %19 = tpu.matmul %1, %18, %cst_15 {dimension_numbers = #tpu.dot_dimension_numbers<[1], [0], [0], [1], [0, 0, 1, 1], [], []>} : vector<24x16xbf16>, vector<16x16xbf16>, vector<24x16xf32> -> vector<24x16xf32>
    %c2_16 = arith.constant 2 : index
    %c0_17 = arith.constant 0 : index
    %c0_18 = arith.constant 0 : index
    %20 = vector.load %arg3[%c2_16, %c0_17, %c0_18] : memref<4x24x16xf32, #tpu.memory_space<vmem>>, vector<1x24x16xf32>
    %21 = vector.shape_cast %20 : vector<1x24x16xf32> to vector<24x16xf32>
    %22 = vector.shape_cast %19 : vector<24x16xf32> to vector<1x24x16xf32>
    tpu.vector_store %arg3[%c2_16, %c0_17, %c0_18], %22 {strides = array<i32>} : memref<4x24x16xf32, #tpu.memory_space<vmem>>, vector<1x24x16xf32>,
    %c3 = arith.constant 3 : index
    %c0_19 = arith.constant 0 : index
    %c0_20 = arith.constant 0 : index
    %23 = vector.load %arg2[%c3, %c0_19, %c0_20] : memref<4x16x16xf32, #tpu.memory_space<vmem>>, vector<1x16x16xf32>
    %24 = vector.shape_cast %23 : vector<1x16x16xf32> to vector<16x16xf32>
    %25 = arith.truncf %24 : vector<16x16xf32> to vector<16x16xbf16>
    %cst_21 = arith.constant dense<0.000000e+00> : vector<24x16xf32>
    %26 = tpu.matmul %1, %25, %cst_21 {dimension_numbers = #tpu.dot_dimension_numbers<[1], [0], [0], [1], [0, 0, 1, 1], [], []>} : vector<24x16xbf16>, vector<16x16xbf16>, vector<24x16xf32> -> vector<24x16xf32>
    %c3_22 = arith.constant 3 : index
    %c0_23 = arith.constant 0 : index
    %c0_24 = arith.constant 0 : index
    %27 = vector.load %arg3[%c3_22, %c0_23, %c0_24] : memref<4x24x16xf32, #tpu.memory_space<vmem>>, vector<1x24x16xf32>
    %28 = vector.shape_cast %27 : vector<1x24x16xf32> to vector<24x16xf32>
    %29 = vector.shape_cast %26 : vector<24x16xf32> to vector<1x24x16xf32>
    tpu.vector_store %arg3[%c3_22, %c0_23, %c0_24], %29 {strides = array<i32>} : memref<4x24x16xf32, #tpu.memory_space<vmem>>, vector<1x24x16xf32>,
    return
  }
  func.func @transform_0(%arg0: i32) -> (i32, i32) {
    %c0_i32 = arith.constant 0 : i32
    %c0_i32_0 = arith.constant 0 : i32
    %c0_i32_1 = arith.constant 0 : i32
    return %c0_i32, %c0_i32_0 : i32, i32
  }
  func.func @transform_1(%arg0: i32) -> (i32, i32, i32) {
    %c0_i32 = arith.constant 0 : i32
    %c0_i32_0 = arith.constant 0 : i32
    %c0_i32_1 = arith.constant 0 : i32
    return %arg0, %c0_i32, %c0_i32_0 : i32, i32, i32
  }
  func.func @transform_2(%arg0: i32) -> (i32, i32, i32) {
    %c0_i32 = arith.constant 0 : i32
    %c0_i32_0 = arith.constant 0 : i32
    %c0_i32_1 = arith.constant 0 : i32
    return %arg0, %c0_i32, %c0_i32_0 : i32, i32, i32
  }
}

</mosaic_0001>

<bundles_post_ra>
// kernel: tpu_custom_call.1
= control target key start
LH: loop header
LB: loop body
LE: loop exit
PB: predicated region body
PF: predicated region fallthrough
CT: control target
= control target key end

     0   :  { %7 = vsyncpa [#allocation3], 0  ;;  %s801_s0 = inlined_call_operand.vmem [shape: f32[24,16], index: 0, kind: input, shape index: {}]   ;;  %s802_s1 = inlined_call_operand.hbm [shape: f32[8,16,16], index: 1, kind: input, shape index: {}]   ;;  %s803_s2 = inlined_call_operand.vmem [shape: f32[8,24,16], index: 2, kind: output, shape index: {}]  }
   0x1   :  { %9 = vsyncpa [#allocation3 + $0x1], 0  ;;  %s672_s9 = smov 0   ;;  %s674_s10 = smov 0  }
   0x2   :  { %s676_s11 = smov 0   ;;  %s678_s12 = smov 0  }
   0x3 LB: > { %s473_s13 = sadd.s32 4294967295, %s652_s12   ;;  %s692_s14 = sadd.s32 1, %s652_s12   ;;  %s652_s12 = sphi %s678_s12, %s812_s12   ;;  %s648_s11 = sphi %s676_s11, %s811_s11   ;;  %s644_s10 = sphi %s674_s10, %s810_s10   ;;  %s640_s9 = sphi %s672_s9, %s809_s9  }
   0x4   : > { %s40_s15 = ssub.s32 %s652_s12, %s692_s14  ;;  %s43_s16 = sadd.s32 1, %s648_s11 }
   0x5   : > { %p41_p0 = scmp.eq.s32.totalorder %s40_s15, 0  ;;  %p50_p1 = scmp.ne.s32.totalorder %s648_s11, %s644_s10 }
   0x6   : > { %p51_p2 = scmp.eq.s32.totalorder %s652_s12, 0  ;;  %p56_p3 = scmp.ne.s32.totalorder %s644_s10, %s640_s9 }
   0x7   : > { %s702_s17 = scalar_select %p41_p0, %s648_s11, %s43_s16  }
   0x8   : > { %p52_p4 = por %p51_p2, %p50_p1  ;;  %p57_p5 = scmp.eq.s32.totalorder %s473_s13, 0 }
   0x9   : > { %p555_p6 = scmp.lt.s32.totalorder %s652_s12, 2  ;;  %s109_s19 = sand.u32 1, %s648_s11  }
   0xa   : > { %p707_p7 = por %p57_p5, %p56_p3  ;;  %s477_s20 = sshll.u32 %s109_s19, 6 }
   0xb   : > { %s511_s21 = sshll.u32 %s652_s12, 10  ;;  %s113_s25 = scalar_lea.vmem [#allocation2], %s477_s20 }
   0xc   : > { %s805_s18 = scalar_select %p707_p7, 1, 0 }
   0xd   : > { %s716_s24 = scalar_lea.hbm %s802_s1, %s511_s21  ;;  %s121_s26 = sshll.u32 %s113_s25, 4  ;;  %s718_s26 = int_to_ptr.vmem [resolvable:$true] %s121_s26 }
   0xe   : > { %p720_p8 = pnand %p555_p6, %p52_p4  ;;  %s725_s28 = scalar_lea.sflag [#allocation3], %s109_s19 }
   0xf   : > { %s590_s29 = scalar_lea.hbm %s716_s24, 1024  ;;  %s595_s4 = scalar_lea.hbm %s802_s1, 2048 }
  0x10   : > { %p591_p10 = scmp.ne.s32.totalorder %s716_s24, %s590_s29  ;;  %p592_p11 = pneg %p720_p8 }
  0x11   : > { %p596_p0 = scmp.lt.s32.totalorder %s716_s24, %s802_s1  ;;  %p597_p1 = scmp.lt.s32.totalorder %s595_s4, %s590_s29 }
  0x12   : > { %p593_p12 = pnand %p592_p11, %p591_p10 }
  0x13   : > { %p598_p2 = por %p597_p1, %p596_p0 }
  0x14   : > { %p594_p13 = pneg %p593_p12 }
  0x16   : > { %p599_p3 = pnand %p598_p2, %p594_p13 }
  0x18   : > { %602 = shalt.err (!%p599_p3)
}
  0x19   : > { %s603_s7 = scalar_lea.vmem %s718_s26, 1024  ;;  %s654_s8 = smov [#allocation2]  }
  0x1a   : > { %p604_p4 = scmp.ne.s32.totalorder %s718_s26, %s603_s7  ;;  %s608_s9 = sshll.u32 %s654_s8, 4  ;;  %s609_s9 = int_to_ptr.vmem [resolvable:$false] %s608_s9 }
  0x1b   : > { %s610_s15 = scalar_lea.vmem %s609_s9, 2048  ;;  %p611_p10 = scmp.lt.s32.totalorder %s718_s26, %s609_s9 }
  0x1c   : > { %p606_p5 = pnand %p604_p4, %p592_p11  ;;  %p612_p12 = scmp.lt.s32.totalorder %s610_s15, %s603_s7 }
  0x1e   : > { %p607_p6 = pneg %p606_p5  ;;  %p613_p9 = por %p612_p12, %p611_p10 }
  0x20   : > { %p614_p7 = pnand %p613_p9, %p607_p6 }
  0x22   : > { %617 = shalt.err (!%p614_p7)
}
  0x23   : > { %s655_s16 = smov 128   ;;  %s656_s19 = smov 8  }
  0x24   : > { %554 = dma.hbm_to_vmem [thread:$0]  (!%p720_p8), %s716_s24, 1024, %s718_s26, %s725_s28, %s655_s16, %s655_s16, %s656_s19  }
  0x25   : > { %p129_p11 = scmp.lt.s32.totalorder %s652_s12, 3  ;;  %p807_p13 = scmp.ge.s32.totalorder %s652_s12, 1 }
  0x27   : > { %p130_p0 = pnand %p807_p13, %p129_p11 }
  0x28   : > { %s135_s20 = sand.u32 (!%p130_p0), 1, %s644_s10   ;;  %p808_p7 = scmp.ne.s32.totalorder (!%p130_p0), %s805_s18, 0 }
  0x29   : > { %133 = sbr.rel (%p130_p0) target bundleno = 263 (0x107), region = 28  ;;  %s482_s21 = sshll.u32 (!%p130_p0), %s135_s20, 6 }
  0x2a   : > { %s136_s22 = scalar_lea.sflag (!%p130_p0), [#allocation3], %s135_s20  ;;  %s139_s23 = scalar_lea.vmem (!%p130_p0), [#allocation2], %s482_s21 }
  0x2e   : > { %635 = dma.done.wait (%p808_p7), %s136_s22, 1024  }
  0x2f   : > { %637 = vsyncadd (%p808_p7), %s136_s22, 4294966272  ;;  %v175_v0 = vld [vmem:[%s139_s23] sm:$0xff]  ;;  %v176_v1 = vld [vmem:[%s139_s23 + $0x8] sm:$0xff]  ;;  %vm178_vm0 = vcmask 130048   ;;  %s483_s18 = sshll.u32 %s473_s13, 2 }
  0x30   : > { %v487_v2 = vld [vmem:[%s139_s23 + $0x10] sm:$0xff]  ;;  %v177_v3 = vpack.c.bf16 %v176_v1, %v175_v0  ;;  %v488_v4 = vld [vmem:[%s139_s23 + $0x18] sm:$0xff]  ;;  %v170_v5 = vld [vmem:[%s801_s0] sm:$0xff]  ;;  %p163_p8 = scmp.lt.s32.totalorder %s483_s18, 7 }
  0x31   : > { %v171_v6 = vld [vmem:[%s801_s0 + $0x8] sm:$0xff]  ;;  %v239_v7 = vpack.c.bf16 %v488_v4, %v487_v2  ;;  %v172_v9 = vld [vmem:[%s801_s0 + $0x10] sm:$0xff]  ;;  %v494_v10 = vld [vmem:[%s139_s23 + $0x20] sm:$0xff] }
  0x32   : > { %v173_v8 = vpack.c.bf16 %v171_v6, %v170_v5  ;;  %v495_v11 = vld [vmem:[%s139_s23 + $0x28] sm:$0xff]  ;;  %524 = vmatprep.subr.bf16.mxu0 %v177_v3  ;;  %v174_v12 = vpack.c.bf16 %v172_v9, %v172_v9  ;;  %v501_v14 = vld [vmem:[%s139_s23 + $0x30] sm:$0xff]  ;;  %v502_v15 = vld [vmem:[%s139_s23 + $0x38] sm:$0xff]  ;;  %s814_s18 = smov (!%p163_p8, %s483_s18), 7 }
  0x33   : > { %v295_v13 = vpack.c.bf16 %v495_v11, %v494_v10  ;;  %530 = vmatprep.subr.bf16.mxu1 %v239_v7  ;;  %525 = vmatpush3.bf16.msra.mxu0 %v177_v3  ;;  %v351_v16 = vpack.c.bf16 %v502_v15, %v501_v14  ;;  %s548_s30 = smul.u32 24, %s814_s18 }
  0x34   : > { %531 = vmatpush3.bf16.msra.mxu1 %v239_v7  ;;  %526 = vmatprep.mubr.msk.bf16.mxu0 %vm178_vm0, %v173_v8 }
  0x35   : > { %532 = vmatprep.mubr.msk.bf16.mxu1 %vm178_vm0, %v173_v8  ;;  %536 = vmatprep.subr.bf16.mxu0 %v295_v13  ;;  %s167_s5 = scalar_lea.vmem %s803_s2, %s548_s30 }
  0x36   : > { %527 = vmatmul.mubr.msk.bf16.vlgmr.msra.gmra.mxu0 %vm178_vm0, %v174_v12  ;;  %542 = vmatprep.subr.bf16.mxu1 %v351_v16 }
  0x37   : > { %533 = vmatmul.mubr.msk.bf16.vlgmr.msra.gmra.mxu1 %vm178_vm0, %v174_v12  ;;  %537 = vmatpush3.bf16.msra.mxu0 %v295_v13 }
  0x38   : > { %543 = vmatpush3.bf16.msra.mxu1 %v351_v16  ;;  %538 = vmatprep.mubr.msk.bf16.mxu0 %vm178_vm0, %v173_v8 }
  0x39   : > { %544 = vmatprep.mubr.msk.bf16.mxu1 %vm178_vm0, %v173_v8 }
  0x3e   : > { %539 = vmatmul.mubr.msk.bf16.vlgmr.msra.gmra.mxu0 %vm178_vm0, %v174_v12 }
  0x3f   : > { %545 = vmatmul.mubr.msk.bf16.vlgmr.msra.gmra.mxu1 %vm178_vm0, %v174_v12 }
  0xf6   : > { %v528_v17 = vpop.f32.mrf.mxu0 }
  0xf7   : > { %235 = vst.msk [vmem:[%s167_s5 + $0x10] sm:$0xff] %vm178_vm0, %v528_v17  ;;  %v534_v18 = vpop.f32.mrf.mxu1 }
  0xf8   : > { %493 = vst.msk [vmem:[%s167_s5 + $0x28] sm:$0xff] %vm178_vm0, %v534_v18  ;;  %v219_v19 = vpop.f32.mrf.mxu0 }
  0xf9   : > { %233 = vst.msk [vmem:[%s167_s5] sm:$0xff] %vm178_vm0, %v219_v19  ;;  %v274_v20 = vpop.f32.mrf.mxu1 }
  0xfa   : > { %491 = vst.msk [vmem:[%s167_s5 + $0x18] sm:$0xff] %vm178_vm0, %v274_v20  ;;  %v529_v21 = vpop.f32.mrf.mxu0 }
  0xfb   : > { %v535_v22 = vpop.f32.mrf.mxu1 }
  0xfc   : > { %v222_v23 = vpop.f32.mrf.mxu0 }
  0xfd   : > { %234 = vst.msk [vmem:[%s167_s5 + $0x8] sm:$0xff] %vm178_vm0, %v222_v23  ;;  %v277_v24 = vpop.f32.mrf.mxu1 }
  0xfe   : > { %492 = vst.msk [vmem:[%s167_s5 + $0x20] sm:$0xff] %vm178_vm0, %v277_v24  ;;  %v540_v25 = vpop.f32.mrf.mxu0 }
  0xff   : > { %500 = vst.msk [vmem:[%s167_s5 + $0x40] sm:$0xff] %vm178_vm0, %v540_v25  ;;  %v546_v26 = vpop.f32.mrf.mxu1 }
 0x100   : > { %507 = vst.msk [vmem:[%s167_s5 + $0x58] sm:$0xff] %vm178_vm0, %v546_v26  ;;  %v330_v27 = vpop.f32.mrf.mxu0 }
 0x101   : > { %498 = vst.msk [vmem:[%s167_s5 + $0x30] sm:$0xff] %vm178_vm0, %v330_v27  ;;  %v386_v28 = vpop.f32.mrf.mxu1 }
 0x102   : > { %505 = vst.msk [vmem:[%s167_s5 + $0x48] sm:$0xff] %vm178_vm0, %v386_v28  ;;  %v541_v29 = vpop.f32.mrf.mxu0 }
 0x103   : > { %v547_v30 = vpop.f32.mrf.mxu1 }
 0x104   : > { %v333_v31 = vpop.f32.mrf.mxu0 }
 0x105   : > { %499 = vst.msk [vmem:[%s167_s5 + $0x38] sm:$0xff] %vm178_vm0, %v333_v31  ;;  %v389_v32 = vpop.f32.mrf.mxu1 }
 0x106   : > { %506 = vst.msk [vmem:[%s167_s5 + $0x50] sm:$0xff] %vm178_vm0, %v389_v32 }
 0x107 PF: > { %p12_p9 = scmp.ge.s32.totalorder %s692_s14, 4   ;;  %s809_s9 = smov %s644_s10 }
 0x108   : > { %s810_s10 = smov %s648_s11  ;;  %s811_s11 = smov %s702_s17 }
 0x109   : > { %s812_s12 = smov %s692_s14  ;;  %14 = sbr.rel (!%p12_p9) target bundleno = 3 (0x3), region = 74 }
 0x10e   :  { %428 = vsyncpa [#allocation3], 1 }
 0x10f   :  { %430 = vsyncpa [#allocation3 + $0x1], 1 }

</bundles_post_ra>
